<compile_context>
chip_gen: v7x
topology: tpu7x:2x2x1
jax: 0.10.0
libtpu: 0.0.40
codegen_flags: <defaults>
</compile_context>

<pallas_src>
import functools

import jax
import jax.numpy as jnp
from jax import lax
from jax.experimental import pallas as pl
from jax.experimental.pallas import tpu as pltpu


def _transpose_conv_block_kernel(x_ref, w_ref, o_ref, *, cout, hw, eps, neg_slope):
    """One batch element per grid step.

    x_ref: (1, Cin, HW)      input tile, HW on the lane axis
    w_ref: (4*Cout, Cin)     packed transpose-conv weights, row = (di*2+dj)*Cout + co
    o_ref: (1, 4*Cout, HW)   output tile (same tap-major row ordering)
    """
    x = x_ref[0]          # (Cin, HW)
    w = w_ref[...]        # (4*Cout, Cin)

    # Fused transpose-conv: one MXU pass, M = 4*Cout, K = Cin, N = HW.
    y = jnp.dot(w, x, preferred_element_type=jnp.float32)   # (4*Cout, HW), f32

    # Per-tap slabs (static, 8-aligned sublane slices); kept live for reuse below.
    slabs = [y[t * cout:(t + 1) * cout] for t in range(4)]   # 4 x (Cout, HW)

    # One-pass InstanceNorm2d statistics per output channel over all 4*HW pixels.
    s = slabs[0] + slabs[1] + slabs[2] + slabs[3]
    s2 = (slabs[0] * slabs[0] + slabs[1] * slabs[1]
          + slabs[2] * slabs[2] + slabs[3] * slabs[3])
    inv_n = 1.0 / (4.0 * hw)
    mean = s.sum(axis=-1, keepdims=True) * inv_n                     # (Cout, 1)
    var = s2.sum(axis=-1, keepdims=True) * inv_n - mean * mean       # biased var
    var = jnp.maximum(var, 0.0)                                      # guard cancellation
    inv = lax.rsqrt(var + eps)                                       # (Cout, 1)

    # Normalize + LeakyReLU(0.2); each store is (Cout, HW) = full-lane, unmasked.
    for t in range(4):
        z = (slabs[t] - mean) * inv
        z = jnp.where(z >= 0.0, z, neg_slope * z)
        o_ref[0, t * cout:(t + 1) * cout, :] = z.astype(o_ref.dtype)


def transpose_conv_block(x, weight, *, eps=1e-5, neg_slope=0.2):
    """x: [N, Cin, H, W] (NCHW), weight: [Cin, Cout, 2, 2] (torch ConvTranspose2d layout).

    Returns [N, Cout, 2H, 2W] (NCHW), matching the PyTorch module semantics.
    """
    N, Cin, H, W = x.shape
    Cout = weight.shape[1]
    HW = H * W

    # NCHW -> [N, Cin, HW]: pure reshape, no HBM transpose pass.
    x_flat = x.reshape(N, Cin, HW)
    # [Cin, Cout, 2, 2] -> (4*Cout, Cin), row = (di*2 + dj)*Cout + co.
    w_packed = jnp.transpose(weight, (2, 3, 1, 0)).reshape(4 * Cout, Cin)

    kernel = functools.partial(
        _transpose_conv_block_kernel, cout=Cout, hw=HW, eps=eps, neg_slope=neg_slope
    )

    # TODO(synk): for production UNet sizes (large H*W / Cin) add an HW grid axis
    # ("arbitrary") with VMEM-scratch stats + a second normalize pass and set
    # vmem_limit_bytes so the one-block-per-sample design fits v7x's 64 MiB VMEM.
    out = pl.pallas_call(
        kernel,
        out_shape=jax.ShapeDtypeStruct((N, 4 * Cout, HW), x.dtype),
        grid_spec=pltpu.PrefetchScalarGridSpec(
            num_scalar_prefetch=0,
            grid=(N,),
            in_specs=[
                pl.BlockSpec((1, Cin, HW), lambda n: (n, 0, 0)),
                pl.BlockSpec((4 * Cout, Cin), lambda n: (0, 0)),
            ],
            out_specs=pl.BlockSpec((1, 4 * Cout, HW), lambda n: (n, 0, 0)),
        ),
        compiler_params=pltpu.CompilerParams(dimension_semantics=("parallel",)),
    )(x_flat, w_packed)

    # out[n, (di*2+dj)*Cout + co, i*W + j] -> [N, Cout, 2H, 2W]
    out = out.reshape(N, 2, 2, Cout, H, W)
    out = jnp.transpose(out, (0, 3, 4, 1, 5, 2)).reshape(N, Cout, 2 * H, 2 * W)
    return out


def _reference(x, weight, eps=1e-5, neg_slope=0.2):
    """Pure-JAX reference (matches torch ConvTranspose2d + InstanceNorm2d + LeakyReLU)."""
    N, Cin, H, W = x.shape
    Cout = weight.shape[1]
    y = jnp.einsum("ncij,copq->noipjq", x, weight).reshape(N, Cout, 2 * H, 2 * W)
    mean = y.mean(axis=(2, 3), keepdims=True)
    var = ((y - mean) ** 2).mean(axis=(2, 3), keepdims=True)
    z = (y - mean) / jnp.sqrt(var + eps)
    return jnp.where(z >= 0, z, neg_slope * z)


if __name__ == "__main__":
    key = jax.random.PRNGKey(0)
    k_x, k_w = jax.random.split(key)

    N, Cin, Cout, H, W = 2, 4, 8, 16, 16
    x = jax.random.normal(k_x, (N, Cin, H, W), dtype=jnp.float32)
    # Deterministic synthetic weights (shape matches nn.ConvTranspose2d(Cin, Cout, 2, 2).weight)
    w_scale = 1.0 / jnp.sqrt(jnp.float32(Cin * 2 * 2))
    weight = jax.random.normal(k_w, (Cin, Cout, 2, 2), dtype=jnp.float32) * w_scale

    out = transpose_conv_block(x, weight)
    out = jax.block_until_ready(out)

    ref = _reference(x, weight)
    assert out.shape == (N, Cout, 2 * H, 2 * W), out.shape
    assert jnp.allclose(out, ref, rtol=1e-4, atol=1e-4), float(jnp.max(jnp.abs(out - ref)))

    print("KERNEL_OK")
</pallas_src>

<mosaic_0001>
module attributes {stable_mosaic.version = 11 : i64} {
  func.func @_transpose_conv_block_kernel(%arg0: i32, %arg1: memref<1x4x256xf32, #tpu.memory_space<vmem>>, %arg2: memref<32x4xf32, #tpu.memory_space<vmem>>, %arg3: memref<1x32x256xf32, #tpu.memory_space<vmem>>) attributes {dimension_semantics = [#tpu.dimension_semantics<parallel>], iteration_bounds = array<i64: 2>, scalar_prefetch = 0 : i64, scratch_operands = 0 : i64, tpu.core_type = #tpu.core_type<tc>, window_params = [{transform_indices = @transform_0, window_bounds = array<i64: 1, 4, 256>}, {pipeline_mode = #tpu.pipeline_mode<synchronous>, transform_indices = @transform_1, window_bounds = array<i64: 32, 4>}, {transform_indices = @transform_2, window_bounds = array<i64: 1, 32, 256>}]} {
    %c0 = arith.constant 0 : index
    %c0_0 = arith.constant 0 : index
    %c0_1 = arith.constant 0 : index
    %0 = vector.load %arg1[%c0, %c0_0, %c0_1] : memref<1x4x256xf32, #tpu.memory_space<vmem>>, vector<1x4x256xf32>
    %1 = vector.shape_cast %0 : vector<1x4x256xf32> to vector<4x256xf32>
    %c0_2 = arith.constant 0 : index
    %c0_3 = arith.constant 0 : index
    %2 = vector.load %arg2[%c0_2, %c0_3] : memref<32x4xf32, #tpu.memory_space<vmem>>, vector<32x4xf32>
    %cst = arith.constant dense<0.000000e+00> : vector<32x256xf32>
    %3 = tpu.matmul %2, %1, %cst {dimension_numbers = #tpu.dot_dimension_numbers<[1], [0], [0], [1], [0, 0, 1, 1], [], []>} : vector<32x4xf32>, vector<4x256xf32>, vector<32x256xf32> -> vector<32x256xf32>
    %4 = vector.extract_strided_slice %3 {offsets = [0, 0], sizes = [8, 256], strides = [1, 1]} : vector<32x256xf32> to vector<8x256xf32>
    %5 = vector.extract_strided_slice %3 {offsets = [8, 0], sizes = [8, 256], strides = [1, 1]} : vector<32x256xf32> to vector<8x256xf32>
    %6 = vector.extract_strided_slice %3 {offsets = [16, 0], sizes = [8, 256], strides = [1, 1]} : vector<32x256xf32> to vector<8x256xf32>
    %7 = vector.extract_strided_slice %3 {offsets = [24, 0], sizes = [8, 256], strides = [1, 1]} : vector<32x256xf32> to vector<8x256xf32>
    %8 = arith.addf %4, %5 : vector<8x256xf32>
    %9 = arith.addf %8, %6 : vector<8x256xf32>
    %10 = arith.addf %9, %7 : vector<8x256xf32>
    %11 = arith.mulf %4, %4 : vector<8x256xf32>
    %12 = arith.mulf %5, %5 : vector<8x256xf32>
    %13 = arith.addf %11, %12 : vector<8x256xf32>
    %14 = arith.mulf %6, %6 : vector<8x256xf32>
    %15 = arith.addf %13, %14 : vector<8x256xf32>
    %16 = arith.mulf %7, %7 : vector<8x256xf32>
    %17 = arith.addf %15, %16 : vector<8x256xf32>
    %cst_4 = arith.constant dense<0.000000e+00> : vector<8xf32>
    %18 = vector.multi_reduction <add>, %10, %cst_4 [1] : vector<8x256xf32> to vector<8xf32>
    %19 = vector.shape_cast %18 : vector<8xf32> to vector<8x1xf32>
    %cst_5 = arith.constant 9.765625E-4 : f32
    %20 = vector.broadcast %cst_5 : f32 to vector<8x1xf32>
    %21 = arith.mulf %19, %20 : vector<8x1xf32>
    %cst_6 = arith.constant dense<0.000000e+00> : vector<8xf32>
    %22 = vector.multi_reduction <add>, %17, %cst_6 [1] : vector<8x256xf32> to vector<8xf32>
    %23 = vector.shape_cast %22 : vector<8xf32> to vector<8x1xf32>
    %cst_7 = arith.constant 9.765625E-4 : f32
    %24 = vector.broadcast %cst_7 : f32 to vector<8x1xf32>
    %25 = arith.mulf %23, %24 : vector<8x1xf32>
    %26 = arith.mulf %21, %21 : vector<8x1xf32>
    %27 = arith.subf %25, %26 : vector<8x1xf32>
    %cst_8 = arith.constant 0.000000e+00 : f32
    %28 = vector.broadcast %cst_8 : f32 to vector<8x1xf32>
    %29 = arith.maximumf %27, %28 : vector<8x1xf32>
    %cst_9 = arith.constant 9.99999974E-6 : f32
    %30 = vector.broadcast %cst_9 : f32 to vector<8x1xf32>
    %31 = arith.addf %29, %30 : vector<8x1xf32>
    %32 = math.rsqrt %31 : vector<8x1xf32>
    %33 = vector.broadcast %21 : vector<8x1xf32> to vector<8x256xf32>
    %34 = arith.subf %4, %33 : vector<8x256xf32>
    %35 = vector.broadcast %32 : vector<8x1xf32> to vector<8x256xf32>
    %36 = arith.mulf %34, %35 : vector<8x256xf32>
    %cst_10 = arith.constant 0.000000e+00 : f32
    %37 = vector.broadcast %cst_10 : f32 to vector<8x256xf32>
    %38 = arith.cmpf oge, %36, %37 : vector<8x256xf32>
    %cst_11 = arith.constant 2.000000e-01 : f32
    %39 = vector.broadcast %cst_11 : f32 to vector<8x256xf32>
    %40 = arith.mulf %39, %36 : vector<8x256xf32>
    %41 = arith.select %38, %36, %40 : vector<8x256xi1>, vector<8x256xf32>
    %c0_12 = arith.constant 0 : index
    %c0_13 = arith.constant 0 : index
    %c0_14 = arith.constant 0 : index
    %42 = vector.load %arg3[%c0_12, %c0_13, %c0_14] : memref<1x32x256xf32, #tpu.memory_space<vmem>>, vector<1x8x256xf32>
    %43 = vector.shape_cast %42 : vector<1x8x256xf32> to vector<8x256xf32>
    %44 = vector.shape_cast %41 : vector<8x256xf32> to vector<1x8x256xf32>
    tpu.vector_store %arg3[%c0_12, %c0_13, %c0_14], %44 {strides = array<i32>} : memref<1x32x256xf32, #tpu.memory_space<vmem>>, vector<1x8x256xf32>,
    %45 = vector.broadcast %21 : vector<8x1xf32> to vector<8x256xf32>
    %46 = arith.subf %5, %45 : vector<8x256xf32>
    %47 = vector.broadcast %32 : vector<8x1xf32> to vector<8x256xf32>
    %48 = arith.mulf %46, %47 : vector<8x256xf32>
    %cst_15 = arith.constant 0.000000e+00 : f32
    %49 = vector.broadcast %cst_15 : f32 to vector<8x256xf32>
    %50 = arith.cmpf oge, %48, %49 : vector<8x256xf32>
    %cst_16 = arith.constant 2.000000e-01 : f32
    %51 = vector.broadcast %cst_16 : f32 to vector<8x256xf32>
    %52 = arith.mulf %51, %48 : vector<8x256xf32>
    %53 = arith.select %50, %48, %52 : vector<8x256xi1>, vector<8x256xf32>
    %c0_17 = arith.constant 0 : index
    %c8 = arith.constant 8 : index
    %c0_18 = arith.constant 0 : index
    %54 = vector.load %arg3[%c0_17, %c8, %c0_18] : memref<1x32x256xf32, #tpu.memory_space<vmem>>, vector<1x8x256xf32>
    %55 = vector.shape_cast %54 : vector<1x8x256xf32> to vector<8x256xf32>
    %56 = vector.shape_cast %53 : vector<8x256xf32> to vector<1x8x256xf32>
    tpu.vector_store %arg3[%c0_17, %c8, %c0_18], %56 {strides = array<i32>} : memref<1x32x256xf32, #tpu.memory_space<vmem>>, vector<1x8x256xf32>,
    %57 = vector.broadcast %21 : vector<8x1xf32> to vector<8x256xf32>
    %58 = arith.subf %6, %57 : vector<8x256xf32>
    %59 = vector.broadcast %32 : vector<8x1xf32> to vector<8x256xf32>
    %60 = arith.mulf %58, %59 : vector<8x256xf32>
    %cst_19 = arith.constant 0.000000e+00 : f32
    %61 = vector.broadcast %cst_19 : f32 to vector<8x256xf32>
    %62 = arith.cmpf oge, %60, %61 : vector<8x256xf32>
    %cst_20 = arith.constant 2.000000e-01 : f32
    %63 = vector.broadcast %cst_20 : f32 to vector<8x256xf32>
    %64 = arith.mulf %63, %60 : vector<8x256xf32>
    %65 = arith.select %62, %60, %64 : vector<8x256xi1>, vector<8x256xf32>
    %c0_21 = arith.constant 0 : index
    %c16 = arith.constant 16 : index
    %c0_22 = arith.constant 0 : index
    %66 = vector.load %arg3[%c0_21, %c16, %c0_22] : memref<1x32x256xf32, #tpu.memory_space<vmem>>, vector<1x8x256xf32>
    %67 = vector.shape_cast %66 : vector<1x8x256xf32> to vector<8x256xf32>
    %68 = vector.shape_cast %65 : vector<8x256xf32> to vector<1x8x256xf32>
    tpu.vector_store %arg3[%c0_21, %c16, %c0_22], %68 {strides = array<i32>} : memref<1x32x256xf32, #tpu.memory_space<vmem>>, vector<1x8x256xf32>,
    %69 = vector.broadcast %21 : vector<8x1xf32> to vector<8x256xf32>
    %70 = arith.subf %7, %69 : vector<8x256xf32>
    %71 = vector.broadcast %32 : vector<8x1xf32> to vector<8x256xf32>
    %72 = arith.mulf %70, %71 : vector<8x256xf32>
    %cst_23 = arith.constant 0.000000e+00 : f32
    %73 = vector.broadcast %cst_23 : f32 to vector<8x256xf32>
    %74 = arith.cmpf oge, %72, %73 : vector<8x256xf32>
    %cst_24 = arith.constant 2.000000e-01 : f32
    %75 = vector.broadcast %cst_24 : f32 to vector<8x256xf32>
    %76 = arith.mulf %75, %72 : vector<8x256xf32>
    %77 = arith.select %74, %72, %76 : vector<8x256xi1>, vector<8x256xf32>
    %c0_25 = arith.constant 0 : index
    %c24 = arith.constant 24 : index
    %c0_26 = arith.constant 0 : index
    %78 = vector.load %arg3[%c0_25, %c24, %c0_26] : memref<1x32x256xf32, #tpu.memory_space<vmem>>, vector<1x8x256xf32>
    %79 = vector.shape_cast %78 : vector<1x8x256xf32> to vector<8x256xf32>
    %80 = vector.shape_cast %77 : vector<8x256xf32> to vector<1x8x256xf32>
    tpu.vector_store %arg3[%c0_25, %c24, %c0_26], %80 {strides = array<i32>} : memref<1x32x256xf32, #tpu.memory_space<vmem>>, vector<1x8x256xf32>,
    return
  }
  func.func @transform_0(%arg0: i32) -> (i32, i32, i32) {
    %c0_i32 = arith.constant 0 : i32
    %c0_i32_0 = arith.constant 0 : i32
    %c0_i32_1 = arith.constant 0 : i32
    return %arg0, %c0_i32, %c0_i32_0 : i32, i32, i32
  }
  func.func @transform_1(%arg0: i32) -> (i32, i32) {
    %c0_i32 = arith.constant 0 : i32
    %c0_i32_0 = arith.constant 0 : i32
    %c0_i32_1 = arith.constant 0 : i32
    return %c0_i32, %c0_i32_0 : i32, i32
  }
  func.func @transform_2(%arg0: i32) -> (i32, i32, i32) {
    %c0_i32 = arith.constant 0 : i32
    %c0_i32_0 = arith.constant 0 : i32
    %c0_i32_1 = arith.constant 0 : i32
    return %arg0, %c0_i32, %c0_i32_0 : i32, i32, i32
  }
}

</mosaic_0001>

<bundles_post_ra>
// kernel: tpu_custom_call.1
= control target key start
LH: loop header
LB: loop body
LE: loop exit
PB: predicated region body
PF: predicated region fallthrough
CT: control target
= control target key end

     0   :  { %7 = vsyncpa [#allocation3], 0  ;;  %s695_s0 = inlined_call_operand.vmem [shape: f32[2,4,256], index: 0, kind: input, shape index: {}]   ;;  %s696_s1 = inlined_call_operand.vmem [shape: f32[32,4], index: 1, kind: input, shape index: {}]   ;;  %s697_s2 = inlined_call_operand.hbm [shape: f32[2,32,256], index: 2, kind: output, shape index: {}]  }
   0x1   :  { %9 = vsyncpa [#allocation3 + $0x1], 0  ;;  %s563_s9 = smov 0   ;;  %s565_s10 = smov 0  }
   0x2   :  { %s567_s11 = smov 0   ;;  %s569_s12 = smov 0  }
   0x3 LB: > { %s584_s13 = sadd.s32 4294967295, %s542_s12   ;;  %s413_s14 = sadd.s32 4294967294, %s542_s12   ;;  %s542_s12 = sphi %s569_s12, %s703_s12   ;;  %s538_s11 = sphi %s567_s11, %s702_s11   ;;  %s534_s10 = sphi %s565_s10, %s701_s10   ;;  %s530_s9 = sphi %s563_s9, %s700_s9  }
   0x4   : > { %s588_s15 = sadd.s32 1, %s542_s12   ;;  %s69_s16 = sadd.s32 1, %s538_s11 }
   0x5   : > { %s66_s17 = ssub.s32 %s542_s12, %s588_s15  ;;  %p79_p0 = scmp.ne.s32.totalorder %s538_s11, %s534_s10 }
   0x6   : > { %p67_p1 = scmp.eq.s32.totalorder %s66_s17, 0  ;;  %p80_p2 = scmp.eq.s32.totalorder %s584_s13, 1 }
   0x7   : > { %p85_p3 = scmp.ne.s32.totalorder %s534_s10, %s530_s9  ;;  %p86_p4 = scmp.eq.s32.totalorder %s413_s14, 1 }
   0x8   : > { %s599_s18 = scalar_select %p67_p1, %s538_s11, %s69_s16  }
   0x9   : > { %p601_p5 = por %p80_p2, %p79_p0  ;;  %p605_p6 = por %p86_p4, %p85_p3 }
   0xa   : > { %p416_p7 = scmp.ge.s32.totalorder %s542_s12, 1  ;;  %p115_p8 = scmp.lt.s32.totalorder %s542_s12, 3 }
   0xc   : > { %p116_p9 = pnand %p416_p7, %p115_p8 }
   0xd   : > { %p137_p10 = scmp.lt.s32.totalorder (!%p116_p9), %s584_s13, 1  ;;  %v544_v0 = vmov (!%p116_p9), 0.0   ;;  %vm162_vm0 = vcmask (!%p116_p9), 1043456   ;;  %v143_v3 = vld [vmem:[%s696_s1] sm:$0xff] (!%p116_p9)  ;;  %vm149_vm1 = vcmask (!%p116_p9), 31744   ;;  %v145_v4 = vld [vmem:[%s696_s1 + $0x10] sm:$0xff] (!%p116_p9) }
   0xe   : > { %119 = sbr.rel (%p116_p9) target bundleno = 445 (0x1bd), region = 28  ;;  %231 = vmatprep.mubr.f32.mxu0 (!%p116_p9), %v544_v0  ;;  %243 = vmatprep.mubr.f32.mxu1 (!%p116_p9), %v544_v0  ;;  %v144_v5 = vld [vmem:[%s696_s1 + $0x8] sm:$0xff] (!%p116_p9)  ;;  %v146_v6 = vld [vmem:[%s696_s1 + $0x18] sm:$0xff] (!%p116_p9)  ;;  %s134_s6 = sand.u32 (!%p116_p9), 1, %s534_s10  }
   0xf   : > { %s417_s7 = sshll.u32 (!%p116_p9), %s134_s6, 6  ;;  %s432_s8 = sshll.u32 (!%p116_p9), %s584_s13, 10 }
  0x10   : > { %s632_s14 = scalar_lea.vmem (!%p116_p9), [#allocation2], %s417_s7  ;;  %s545_s24 = smov (!%p116_p9), [#allocation2]  }
  0x11   : > { %s351_s16 = sshll.u32 (!%p116_p9), %s632_s14, 4  ;;  %s644_s16 = int_to_ptr.vmem [resolvable:$true] %s351_s16 }
  0x12   : > { %s480_s23 = scalar_lea.vmem (!%p116_p9), %s644_s16, 1024 }
  0x13   : > { %p481_p11 = scmp.ne.s32.totalorder (!%p116_p9), %s644_s16, %s480_s23 }
  0x15   : > { %s138_s21 = scalar_select %p137_p10, %s584_s13, 1 }
  0x16   : > { %p482_p12 = pnand %p481_p11, %p601_p5 }
  0x17   : > { %s431_s22 = sshll.u32 %s138_s21, 3  ;;  %s642_s21 = scalar_lea.hbm %s697_s2, %s432_s8 }
  0x18   : > { %s141_s25 = scalar_lea.vmem %s695_s0, %s431_s22  ;;  %s654_s22 = scalar_lea.sflag [#allocation3], %s134_s6 }
  0x19   : > { %v142_v1 = vld [vmem:[%s141_s25] sm:$0xff]  ;;  %p483_p13 = pneg %p482_p12  ;;  %s484_s25 = sshll.u32 %s545_s24, 4  ;;  %s485_s25 = int_to_ptr.vmem [resolvable:$false] %s484_s25 }
  0x1a   : > { %v148_v2 = vcombine.high %v142_v1, %v142_v1  ;;  %s486_s26 = scalar_lea.vmem %s485_s25, 2048  ;;  %p487_p0 = scmp.lt.s32.totalorder %s644_s16, %s485_s25 }
  0x1b   : > { %p488_p1 = scmp.lt.s32.totalorder %s486_s26, %s480_s23 }
  0x1c   : > { %420 = vmatprep.subr.msk.mxu0 %vm162_vm0, %v148_v2  ;;  %433 = vmatprep.subr.msk.mxu1 %vm162_vm0, %v148_v2 }
  0x1d   : > { %421 = vmatpush1.msk.msra.mxu0 %vm162_vm0, %v142_v1  ;;  %434 = vmatpush1.msk.msra.mxu1 %vm162_vm0, %v142_v1  ;;  %p489_p2 = por %p488_p1, %p487_p0 }
  0x1e   : > { %422 = vmatmul.mubr.msk.f32.vlgmr.msra.gmra.mrb[0].mxu0 %vm149_vm1, %v143_v3  ;;  %424 = vmatmul.mubr.msk.f32.vlgmr.msra.gmra.mrb[0].mxu1 %vm149_vm1, %v145_v4 }
  0x1f   : > { %237 = vmatprep.mubr.f32.mxu0 %v544_v0  ;;  %249 = vmatprep.mubr.f32.mxu1 %v544_v0  ;;  %p490_p3 = pnand %p489_p2, %p483_p13 }
  0x22   : > { %423 = vmatmul.mubr.msk.f32.gmra.mrb[2].mxu0 %vm149_vm1, %v144_v5  ;;  %425 = vmatmul.mubr.msk.f32.gmra.mrb[2].mxu1 %vm149_vm1, %v146_v6 }
  0xf1   : > { %v233_v7 = vpop.f32.mrb[0].mxu0  ;;  %v245_v8 = vpop.f32.mrb[0].mxu1 }
  0xf2   : > { %v235_v9 = vpop.f32.mrb[1].mxu0  ;;  %v247_v10 = vpop.f32.mrb[1].mxu1  ;;  %v262_v13 = vmul.f32 %v233_v7, %v233_v7  ;;  %v268_v21 = vmul.f32 %v245_v8, %v245_v8 }
  0xf3   : > { %v263_v18 = vmul.f32 %v235_v9, %v235_v9  ;;  %v269_v25 = vmul.f32 %v247_v10, %v247_v10 }
  0xf5   : > { %v239_v11 = vpop.f32.mrb[2].mxu0  ;;  %v251_v12 = vpop.f32.mrb[2].mxu1 }
  0xf6   : > { %v256_v14 = vadd.f32 %v239_v11, %v233_v7  ;;  %v264_v15 = vmul.f32 %v239_v11, %v239_v11  ;;  %v241_v16 = vpop.f32.mrb[3].mxu0  ;;  %v253_v17 = vpop.f32.mrb[3].mxu1  ;;  %v272_v23 = vmul.f32 %v251_v12, %v251_v12 }
  0xf7   : > { %v257_v19 = vadd.f32 %v241_v16, %v235_v9  ;;  %v265_v20 = vmul.f32 %v241_v16, %v241_v16  ;;  %v273_v28 = vmul.f32 %v253_v17, %v253_v17 }
  0xf8   : > { %v266_v22 = vadd.f32 %v264_v15, %v262_v13  ;;  %v258_v24 = vadd.f32 %v256_v14, %v245_v8 }
  0xf9   : > { %v267_v26 = vadd.f32 %v265_v20, %v263_v18  ;;  %v259_v27 = vadd.f32 %v257_v19, %v247_v10 }
  0xfa   : > { %v260_v29 = vadd.f32 %v258_v24, %v251_v12  ;;  %v270_v30 = vadd.f32 %v268_v21, %v266_v22 }
  0xfb   : > { %v261_v31 = vadd.f32 %v259_v27, %v253_v17  ;;  %v271_v32 = vadd.f32 %v269_v25, %v267_v26 }
  0xfc   : > { %v274_v33 = vadd.f32 %v272_v23, %v270_v30 }
  0xfd   : > { %v276_v34 = vadd.f32 %v261_v31, %v260_v29  ;;  %v275_v35 = vadd.f32 %v273_v28, %v271_v32 }
  0xff   : > { %277 = vadd.xlane.f32.xlu0 %v276_v34  ;;  %v280_v36 = vadd.f32 %v275_v35, %v274_v33 }
 0x103   : > { %281 = vadd.xlane.f32.xlu0 %v280_v36 }
 0x18c   : > { %v278_v37 = vpop.xlane.xlu0 %277 }
 0x18d   : > { %v279_v38 = vmul.f32 0.0009765625, %v278_v37 }
 0x18f   : > { %v284_v40 = vmul.f32 %v279_v38, %v279_v38  ;;  %v289_v45 = vsub.f32 %v233_v7, %v279_v38  ;;  %v290_v46 = vsub.f32 %v235_v9, %v279_v38  ;;  %v301_v47 = vsub.f32 %v239_v11, %v279_v38 }
 0x190   : > { %v282_v39 = vpop.xlane.xlu0 %281  ;;  %v302_v48 = vsub.f32 %v241_v16, %v279_v38  ;;  %v313_v50 = vsub.f32 %v245_v8, %v279_v38  ;;  %v314_v51 = vsub.f32 %v247_v10, %v279_v38  ;;  %v325_v52 = vsub.f32 %v251_v12, %v279_v38 }
 0x191   : > { %v283_v41 = vmul.f32 0.0009765625, %v282_v39  ;;  %v326_v53 = vsub.f32 %v253_v17, %v279_v38 }
 0x193   : > { %v285_v42 = vsub.f32 %v283_v41, %v284_v40 }
 0x195   : > { %v286_v43 = vmax.f32 %v285_v42, 0.0 }
 0x197   : > { %v287_v44 = vadd.f32 1e-05, %v286_v43 }
 0x199   : > { %478 = vrsqrt.f32 %v287_v44 }
 0x1a3   : > { %v479_v49 = vpop.eup %478 }
 0x1a4   : > { %v291_v54 = vmul.f32 %v479_v49, %v289_v45  ;;  %v292_v55 = vmul.f32 %v479_v49, %v290_v46  ;;  %v303_v56 = vmul.f32 %v479_v49, %v301_v47  ;;  %v304_v57 = vmul.f32 %v479_v49, %v302_v48 }
 0x1a5   : > { %v315_v58 = vmul.f32 %v479_v49, %v313_v50  ;;  %v316_v59 = vmul.f32 %v479_v49, %v314_v51  ;;  %v327_v60 = vmul.f32 %v479_v49, %v325_v52  ;;  %v328_v61 = vmul.f32 %v479_v49, %v326_v53 }
 0x1a6   : > { %vm293_vm2 = vcmp.ge.f32.partialorder %v291_v54, 0.0  ;;  %vm294_vm3 = vcmp.ge.f32.partialorder %v292_v55, 0.0  ;;  %v295_v62 = vmul.f32 0.2, %v291_v54  ;;  %v296_v63 = vmul.f32 0.2, %v292_v55 }
 0x1a7   : > { %vm305_vm4 = vcmp.ge.f32.partialorder %v303_v56, 0.0  ;;  %vm306_vm5 = vcmp.ge.f32.partialorder %v304_v57, 0.0  ;;  %v307_v0 = vmul.f32 0.2, %v303_v56  ;;  %v308_v1 = vmul.f32 0.2, %v304_v57 }
 0x1a8   : > { %v297_v2 = vsel %vm293_vm2, %v291_v54, %v295_v62  ;;  %v298_v3 = vsel %vm294_vm3, %v292_v55, %v296_v63  ;;  %vm317_vm6 = vcmp.ge.f32.partialorder %v315_v58, 0.0  ;;  %vm318_vm7 = vcmp.ge.f32.partialorder %v316_v59, 0.0 }
 0x1a9   : > { %299 = vst [vmem:[%s632_s14] sm:$0xff] %v297_v2  ;;  %300 = vst [vmem:[%s632_s14 + $0x8] sm:$0xff] %v298_v3  ;;  %v309_v4 = vsel %vm305_vm4, %v303_v56, %v307_v0  ;;  %v310_v5 = vsel %vm306_vm5, %v304_v57, %v308_v1  ;;  %v319_v6 = vmul.f32 0.2, %v315_v58  ;;  %v320_v7 = vmul.f32 0.2, %v316_v59 }
 0x1aa   : > { %311 = vst [vmem:[%s632_s14 + $0x10] sm:$0xff] %v309_v4  ;;  %312 = vst [vmem:[%s632_s14 + $0x18] sm:$0xff] %v310_v5  ;;  %vm329_vm8 = vcmp.ge.f32.partialorder %v327_v60, 0.0  ;;  %vm330_vm9 = vcmp.ge.f32.partialorder %v328_v61, 0.0  ;;  %v331_v8 = vmul.f32 0.2, %v327_v60 }
 0x1ab   : > { %v332_v9 = vmul.f32 0.2, %v328_v61  ;;  %v321_v10 = vsel %vm317_vm6, %v315_v58, %v319_v6  ;;  %v322_v11 = vsel %vm318_vm7, %v316_v59, %v320_v7 }
 0x1ac   : > { %323 = vst [vmem:[%s632_s14 + $0x20] sm:$0xff] %v321_v10  ;;  %324 = vst [vmem:[%s632_s14 + $0x28] sm:$0xff] %v322_v11  ;;  %v333_v12 = vsel %vm329_vm8, %v327_v60, %v331_v8 }
 0x1ad   : > { %v334_v13 = vsel %vm330_vm9, %v328_v61, %v332_v9  ;;  %335 = vst [vmem:[%s632_s14 + $0x30] sm:$0xff] %v333_v12 }
 0x1ae   : > { %336 = vst [vmem:[%s632_s14 + $0x38] sm:$0xff] %v334_v13 }
 0x1af   : > { %493 = shalt.err (!%p490_p3)
}
 0x1b0   : > { %s494_s27 = scalar_lea.hbm %s642_s21, 1024  ;;  %s498_s30 = scalar_lea.hbm %s697_s2, 2048 }
 0x1b1   : > { %p495_p4 = scmp.ne.s32.totalorder %s642_s21, %s494_s27  ;;  %p499_p9 = scmp.lt.u32.totalorder %s642_s21, %s697_s2 }
 0x1b2   : > { %p500_p10 = scmp.lt.u32.totalorder %s498_s30, %s494_s27  ;;  %p502_p12 = scmp.lt.u32.totalorder %s494_s27, %s642_s21 }
 0x1b3   : > { %p496_p7 = pnand %p495_p4, %p601_p5 }
 0x1b4   : > { %p501_p11 = por %p500_p10, %p499_p9 }
 0x1b5   : > { %p497_p8 = pneg %p496_p7 }
 0x1b6   : > { %p503_p13 = por %p502_p12, %p501_p11 }
 0x1b8   : > { %p504_p0 = pnand %p503_p13, %p497_p8 }
 0x1ba   : > { %507 = shalt.err (!%p504_p0)
}
 0x1bb   : > { %s546_s5 = smov 256   ;;  %s547_s6 = smov 16  }
 0x1bc   : > { %435 = dma.vmem_to_hbm [thread:$0]  (%p601_p5), %s644_s16, 1024, %s642_s21, %s654_s22, %s546_s5, %s546_s5, %s547_s6  }
 0x1bd PF: > { %p441_p1 = scmp.ge.s32.totalorder %s542_s12, 2  ;;  %s366_s7 = sand.u32 1, %s530_s9  }
 0x1be   : > { %s367_s8 = scalar_lea.sflag [#allocation3], %s366_s7 }
 0x1bf   : > { %p438_p2 = pnand %p441_p1, %p605_p6 }
 0x1c1   : > { %525 = dma.done.wait (!%p438_p2), %s367_s8, 1024  }
 0x1c2   : > { %527 = vsyncadd (!%p438_p2), %s367_s8, 4294966272  ;;  %p12_p3 = scmp.ge.s32.totalorder %s588_s15, 4   ;;  %s700_s9 = smov %s534_s10 }
 0x1c3   : > { %s701_s10 = smov %s538_s11  ;;  %s702_s11 = smov %s599_s18 }
 0x1c4   : > { %s703_s12 = smov %s588_s15  ;;  %14 = sbr.rel (!%p12_p3) target bundleno = 3 (0x3), region = 63 }
 0x1cb   :  { %372 = vsyncpa [#allocation3], 1 }
 0x1cc   :  { %374 = vsyncpa [#allocation3 + $0x1], 1 }

</bundles_post_ra>
